<compile_context>
chip_gen: v6e
topology: v6e:2x2x1
jax: 0.10.0
libtpu: 0.0.40
codegen_flags: <defaults>
</compile_context>

<pallas_src>
import jax
import jax.numpy as jnp
from jax.experimental import pallas as pl
from jax.experimental.pallas import tpu as pltpu


def _round_up(n, m):
    return (n + m - 1) // m * m


def _cdiv(a, b):
    return -(-a // b)


def _vmem_capacity_bytes():
    try:
        return int(pltpu.get_tpu_info().vmem_capacity_bytes)
    except Exception:
        return 64 << 20  # conservative fallback (v7x per-core VMEM)


def fc_kernel(x_ref, w1_ref, w2_ref, o_ref, acc_ref):
    """grid = (batch_tiles, hidden_tiles); hidden axis is a reduction axis."""
    h_idx = pl.program_id(1)

    @pl.when(h_idx == 0)
    def _():
        acc_ref[...] = jnp.zeros_like(acc_ref)

    # First matmul on the MXU (f32 accumulate), relu on the VPU, cast back to
    # bf16 so the second MXU pass also runs at the bf16 rate.
    h = jnp.dot(x_ref[...], w1_ref[...], preferred_element_type=jnp.float32)
    h = jnp.maximum(h, 0.0).astype(w2_ref.dtype)
    acc_ref[...] += jnp.dot(h, w2_ref[...], preferred_element_type=jnp.float32)

    @pl.when(h_idx == pl.num_programs(1) - 1)
    def _():
        o_ref[...] = acc_ref[...].astype(o_ref.dtype)


def _pad2d(a, rows, cols, dtype):
    a = a.astype(dtype)
    r, c = a.shape
    if r == rows and c == cols:
        return a  # already aligned: no extra HBM round trip
    return jnp.pad(a, ((0, rows - r), (0, cols - c)))  # zero pad (transparent: relu(0)=0)


def make_fc_forward(w_hidden, w_predict, *, tm_max=1024, compute_dtype=jnp.bfloat16):
    """Prepare padded bf16 weights + tiling policy once; return a jitted forward(x)."""
    n_feature, n_hidden = w_hidden.shape
    n_hidden2, n_output = w_predict.shape
    assert n_hidden2 == n_hidden
    itemsize = jnp.dtype(compute_dtype).itemsize

    # Lane / MXU alignment on the contraction and output dims.
    Kp = _round_up(n_feature, 128)
    Np = _round_up(n_output, 128)
    Hp0 = _round_up(n_hidden, 128)

    capacity = _vmem_capacity_bytes()
    budget = int(capacity * 0.75)      # ~96 MiB on v5e/v6e (128 MiB), ~48 MiB on v7x (64 MiB)
    w_budget = int(budget * 0.6)       # share of VMEM we allow the weights to take

    # ---- weight residency policy -------------------------------------------
    if (Kp + Np) * Hp0 * itemsize * 2 <= w_budget:
        TH, w_bufs = Hp0, 2            # resident, default (double) buffering
    elif (Kp + Np) * Hp0 * itemsize <= w_budget:
        TH, w_bufs = Hp0, 1            # resident only if single-buffered -> pl.Buffered(1)
    else:
        TH, w_bufs = Hp0, 2            # tile the hidden dim (accumulator path)
        while TH > 128 and (Kp + Np) * TH * itemsize * 2 > w_budget:
            TH = _round_up(_cdiv(TH, 2), 128)
    Hp = _round_up(Hp0, TH)            # make H a multiple of TH so no partial weight blocks
    num_ht = Hp // TH
    single_buffer_weights = (num_ht == 1 and w_bufs == 1)
    weight_bytes = (Kp + Np) * TH * itemsize * w_bufs

    # Pad + cast weights ONCE (not per forward call).
    w1_p = _pad2d(w_hidden, Kp, Hp, compute_dtype)
    w2_p = _pad2d(w_predict, Hp, Np, compute_dtype)

    # VMEM bytes per batch-tile row: x (2 bufs, bf16) + out (2 bufs, f32)
    # + f32 accumulator + f32 hidden intermediate.
    row_bytes = 2 * Kp * itemsize + 2 * Np * 4 + Np * 4 + TH * 4
    tm_cap = max(8, (budget - weight_bytes) // row_bytes // 8 * 8)
    tm_max_eff = int(min(tm_max, tm_cap))

    def _forward(x, w1_p, w2_p):
        batch = x.shape[0]

        # Balanced batch tiles; force >=2 tiles when possible so both v7x
        # TensorCores get work on the "parallel" axis (free on v5e/v6e).
        num_bt = max(1, _cdiv(batch, tm_max_eff))
        if num_bt == 1 and batch >= 16:
            num_bt = 2
        TM = _cdiv(batch, num_bt)
        if TM != batch:
            TM = _round_up(TM, 8)      # sublane alignment (pow-2 batches give 128/256-aligned TM)
        Bp = _round_up(batch, TM)      # only pads when batch isn't a TM multiple
        n_bt = Bp // TM

        x_p = _pad2d(x, Bp, Kp, compute_dtype)

        w_pipe = {"pipeline_mode": pl.Buffered(1)} if single_buffer_weights else {}
        est = weight_bytes + TM * row_bytes
        vmem_limit = int(min(capacity * 0.9, max(est + (8 << 20), 32 << 20)))

        out_p = pl.pallas_call(
            fc_kernel,
            out_shape=jax.ShapeDtypeStruct((Bp, Np), jnp.float32),
            grid_spec=pltpu.PrefetchScalarGridSpec(
                num_scalar_prefetch=0,
                grid=(n_bt, num_ht),                       # hidden (reduction) axis last
                in_specs=[
                    pl.BlockSpec((TM, Kp), lambda i, h: (i, 0)),          # x streams over batch
                    pl.BlockSpec((Kp, TH), lambda i, h: (0, h), **w_pipe),  # W1 (resident or H-tiled)
                    pl.BlockSpec((TH, Np), lambda i, h: (h, 0), **w_pipe),  # W2 (resident or H-tiled)
                ],
                out_specs=pl.BlockSpec((TM, Np), lambda i, h: (i, 0)),
                scratch_shapes=[pltpu.VMEM((TM, Np), jnp.float32)],       # f32 accumulator
            ),
            compiler_params=pltpu.CompilerParams(
                dimension_semantics=("parallel", "arbitrary"),
                vmem_limit_bytes=vmem_limit,
            ),
        )(x_p, w1_p, w2_p)

        return out_p[:batch, :n_output]

    fwd = jax.jit(_forward)
    return lambda x: fwd(x, w1_p, w2_p)


def fc_forward(x, w_hidden, w_predict):
    """One-shot convenience wrapper (builds the padded weights each call)."""
    return make_fc_forward(w_hidden, w_predict)(x)


if __name__ == "__main__":
    # Shapes implied by the module: x:(batch, n_feature), W1:(n_feature, n_hidden),
    # W2:(n_hidden, n_output)
    batch, n_feature, n_hidden, n_output = 8, 32, 64, 16

    key = jax.random.PRNGKey(0)
    kx, k1, k2 = jax.random.split(key, 3)
    x = jax.random.normal(kx, (batch, n_feature), dtype=jnp.float32)
    w_hidden = jax.random.normal(k1, (n_feature, n_hidden), dtype=jnp.float32)
    w_predict = jax.random.normal(k2, (n_hidden, n_output), dtype=jnp.float32)

    forward = make_fc_forward(w_hidden, w_predict)
    out = jax.block_until_ready(forward(x))

    # pure-JAX f32 reference; bf16 MXU inputs with f32 accumulation -> loose tolerance
    ref = jnp.maximum(x @ w_hidden, 0.0) @ w_predict
    assert out.shape == (batch, n_output)
    err = float(jnp.max(jnp.abs(out - ref)) / jnp.max(jnp.abs(ref)))
    assert err < 2e-2, f"max relative error too large: {err}"

    print("KERNEL_OK")
</pallas_src>

<mosaic_0001>
module attributes {stable_mosaic.version = 11 : i64} {
  func.func @fc_kernel(%arg0: i32, %arg1: i32, %arg2: memref<8x128xbf16, #tpu.memory_space<vmem>>, %arg3: memref<128x128xbf16, #tpu.memory_space<vmem>>, %arg4: memref<128x128xbf16, #tpu.memory_space<vmem>>, %arg5: memref<8x128xf32, #tpu.memory_space<vmem>>, %arg6: memref<8x128xf32, #tpu.memory_space<vmem>>) attributes {dimension_semantics = [#tpu.dimension_semantics<parallel>, #tpu.dimension_semantics<arbitrary>], iteration_bounds = array<i64: 1, 1>, scalar_prefetch = 0 : i64, scratch_operands = 1 : i64, tpu.core_type = #tpu.core_type<tc>, window_params = [{transform_indices = @transform_0, window_bounds = array<i64: 8, 128>}, {transform_indices = @transform_1, window_bounds = array<i64: 128, 128>}, {transform_indices = @transform_2, window_bounds = array<i64: 128, 128>}, {transform_indices = @transform_3, window_bounds = array<i64: 8, 128>}]} {
    %c0_i32 = arith.constant 0 : i32
    %0 = arith.cmpi eq, %arg1, %c0_i32 : i32
    %1 = arith.extui %0 : i1 to i32
    %c0_i32_0 = arith.constant 0 : i32
    %2 = arith.cmpi ne, %1, %c0_i32_0 : i32
    scf.if %2 {
      %cst_14 = arith.constant 0.000000e+00 : f32
      %17 = vector.broadcast %cst_14 : f32 to vector<8x128xf32>
      %c0_15 = arith.constant 0 : index
      %c0_16 = arith.constant 0 : index
      %18 = vector.load %arg6[%c0_15, %c0_16] : memref<8x128xf32, #tpu.memory_space<vmem>>, vector<8x128xf32>
      tpu.vector_store %arg6[%c0_15, %c0_16], %17 {strides = array<i32>} : memref<8x128xf32, #tpu.memory_space<vmem>>, vector<8x128xf32>,
    } else {
    }
    %c0 = arith.constant 0 : index
    %c0_1 = arith.constant 0 : index
    %3 = vector.load %arg2[%c0, %c0_1] : memref<8x128xbf16, #tpu.memory_space<vmem>>, vector<8x128xbf16>
    %c0_2 = arith.constant 0 : index
    %c0_3 = arith.constant 0 : index
    %4 = vector.load %arg3[%c0_2, %c0_3] : memref<128x128xbf16, #tpu.memory_space<vmem>>, vector<128x128xbf16>
    %cst = arith.constant dense<0.000000e+00> : vector<8x128xf32>
    %5 = tpu.matmul %3, %4, %cst {dimension_numbers = #tpu.dot_dimension_numbers<[1], [0], [0], [1], [0, 0, 1, 1], [], []>} : vector<8x128xbf16>, vector<128x128xbf16>, vector<8x128xf32> -> vector<8x128xf32>
    %cst_4 = arith.constant 0.000000e+00 : f32
    %6 = vector.broadcast %cst_4 : f32 to vector<8x128xf32>
    %7 = arith.maximumf %5, %6 : vector<8x128xf32>
    %8 = arith.truncf %7 : vector<8x128xf32> to vector<8x128xbf16>
    %c0_5 = arith.constant 0 : index
    %c0_6 = arith.constant 0 : index
    %9 = vector.load %arg6[%c0_5, %c0_6] : memref<8x128xf32, #tpu.memory_space<vmem>>, vector<8x128xf32>
    %c0_7 = arith.constant 0 : index
    %c0_8 = arith.constant 0 : index
    %10 = vector.load %arg4[%c0_7, %c0_8] : memref<128x128xbf16, #tpu.memory_space<vmem>>, vector<128x128xbf16>
    %cst_9 = arith.constant dense<0.000000e+00> : vector<8x128xf32>
    %11 = tpu.matmul %8, %10, %cst_9 {dimension_numbers = #tpu.dot_dimension_numbers<[1], [0], [0], [1], [0, 0, 1, 1], [], []>} : vector<8x128xbf16>, vector<128x128xbf16>, vector<8x128xf32> -> vector<8x128xf32>
    %12 = arith.addf %9, %11 : vector<8x128xf32>
    %c0_10 = arith.constant 0 : index
    %c0_11 = arith.constant 0 : index
    %13 = vector.load %arg6[%c0_10, %c0_11] : memref<8x128xf32, #tpu.memory_space<vmem>>, vector<8x128xf32>
    tpu.vector_store %arg6[%c0_10, %c0_11], %12 {strides = array<i32>} : memref<8x128xf32, #tpu.memory_space<vmem>>, vector<8x128xf32>,
    %c0_i32_12 = arith.constant 0 : i32
    %14 = arith.cmpi eq, %arg1, %c0_i32_12 : i32
    %15 = arith.extui %14 : i1 to i32
    %c0_i32_13 = arith.constant 0 : i32
    %16 = arith.cmpi ne, %15, %c0_i32_13 : i32
    scf.if %16 {
      %c0_14 = arith.constant 0 : index
      %c0_15 = arith.constant 0 : index
      %17 = vector.load %arg6[%c0_14, %c0_15] : memref<8x128xf32, #tpu.memory_space<vmem>>, vector<8x128xf32>
      %c0_16 = arith.constant 0 : index
      %c0_17 = arith.constant 0 : index
      %18 = vector.load %arg5[%c0_16, %c0_17] : memref<8x128xf32, #tpu.memory_space<vmem>>, vector<8x128xf32>
      tpu.vector_store %arg5[%c0_16, %c0_17], %17 {strides = array<i32>} : memref<8x128xf32, #tpu.memory_space<vmem>>, vector<8x128xf32>,
    } else {
    }
    return
  }
  func.func @transform_0(%arg0: i32, %arg1: i32) -> (i32, i32) {
    %c0_i32 = arith.constant 0 : i32
    %c0_i32_0 = arith.constant 0 : i32
    return %arg0, %c0_i32 : i32, i32
  }
  func.func @transform_1(%arg0: i32, %arg1: i32) -> (i32, i32) {
    %c0_i32 = arith.constant 0 : i32
    %c0_i32_0 = arith.constant 0 : i32
    return %c0_i32, %arg1 : i32, i32
  }
  func.func @transform_2(%arg0: i32, %arg1: i32) -> (i32, i32) {
    %c0_i32 = arith.constant 0 : i32
    %c0_i32_0 = arith.constant 0 : i32
    return %arg1, %c0_i32 : i32, i32
  }
  func.func @transform_3(%arg0: i32, %arg1: i32) -> (i32, i32) {
    %c0_i32 = arith.constant 0 : i32
    %c0_i32_0 = arith.constant 0 : i32
    return %arg0, %c0_i32 : i32, i32
  }
}

</mosaic_0001>

<bundles_post_ra>
// kernel: _forward.1
= control target key start
LH: loop header
LB: loop body
LE: loop exit
PB: predicated region body
PF: predicated region fallthrough
CT: control target
= control target key end

     0   :  { %8 = vsyncpa [#allocation4], 0  ;;  %s486_s0 = inlined_call_operand.vmem [shape: bf16[8,128], index: 0, kind: input, shape index: {}]   ;;  %s487_s1 = inlined_call_operand.hbm [shape: bf16[128,128], index: 1, kind: input, shape index: {}]   ;;  %s488_s2 = inlined_call_operand.hbm [shape: bf16[128,128], index: 2, kind: input, shape index: {}]   ;;  %s489_s3 = inlined_call_operand.hbm [shape: f32[8,128], index: 3, kind: output, shape index: {}]  }
   0x1   :  { %9 = vsyncpa [#allocation7], 0 }
   0x2   :  { %10 = vsyncpa [#allocation5], 0  ;;  %s447_s12 = smov [#allocation3]  }
   0x3   :  { %s18_s13 = sshll.u32 %s447_s12, 4  ;;  %s19_s13 = int_to_ptr.vmem [resolvable:$true] %s18_s13 }
   0x4   :  { %s389_s14 = scalar_lea.vmem %s19_s13, 1024  ;;  %p394_p1 = scmp.lt.s32.totalorder %s19_s13, %s19_s13 }
   0x5   :  { %p390_p0 = scmp.ne.s32.totalorder %s19_s13, %s389_s14  ;;  %p395_p2 = scmp.lt.s32.totalorder %s389_s14, %s389_s14 }
   0x7   :  { %p396_p3 = por %p395_p2, %p394_p1 }
   0x9   :  { %p397_p4 = pnand %p396_p3, %p390_p0 }
   0xb   :  { %400 = shalt.err (!%p397_p4)
}
   0xc   :  { %s448_s15 = smov 64   ;;  %s449_s16 = smov 4  }
   0xd   :  { %24 = dma.hbm_to_vmem [thread:$0]  %s487_s1, 1024, %s19_s13, [#allocation4], %s448_s15, %s448_s15, %s449_s16  }
   0xe   :  { %s450_s19 = smov [#allocation6]  }
   0xf   :  { %s30_s20 = sshll.u32 %s450_s19, 4  ;;  %s31_s20 = int_to_ptr.vmem [resolvable:$true] %s30_s20 }
  0x10   :  { %s409_s21 = scalar_lea.vmem %s31_s20, 1024  ;;  %p414_p6 = scmp.lt.s32.totalorder %s31_s20, %s31_s20 }
  0x11   :  { %p410_p5 = scmp.ne.s32.totalorder %s31_s20, %s409_s21  ;;  %p415_p7 = scmp.lt.s32.totalorder %s409_s21, %s409_s21 }
  0x13   :  { %p416_p8 = por %p415_p7, %p414_p6 }
  0x15   :  { %p417_p9 = pnand %p416_p8, %p410_p5 }
  0x17   :  { %420 = shalt.err (!%p417_p9)
}
  0x18   :  { %36 = dma.hbm_to_vmem [thread:$0]  %s488_s2, 1024, %s31_s20, [#allocation7], %s448_s15, %s448_s15, %s449_s16  }
  0x19   :  { %441 = dma.done.wait [#allocation4], 1024  }
  0x1a   :  { %442 = vsyncadd [#allocation4], 4294966272 }
  0x1b   :  { %443 = dma.done.wait [#allocation7], 1024  }
  0x1c   :  { %444 = vsyncadd [#allocation7], 4294966272  ;;  %v451_v0 = vmov 0.0   ;;  %vm452_vm0 = vmmov 0   ;;  %v365_v1 = vld [vmem:[#allocation3 + $0x38] sm:$0xff]   ;;  %v366_v2 = vld [vmem:[#allocation3 + $0x30] sm:$0xff]  }
  0x1d   :  { %318 = vmatprep.subr.bf16.mxu0 %v451_v0  ;;  %334 = vmatprep.mubr.msk.bf16.mxu0 %vm452_vm0, %v451_v0  ;;  %v367_v3 = vld [vmem:[#allocation3 + $0x28] sm:$0xff]   ;;  %v373_v4 = vld [vmem:[#allocation6 + $0x38] sm:$0xff]   ;;  %v368_v5 = vld [vmem:[#allocation3 + $0x20] sm:$0xff]   ;;  %s453_s24 = smov [#allocation8]  }
  0x1e   :  { %338 = vmatprep.subr.bf16.mxu1 %v451_v0  ;;  %354 = vmatprep.mubr.msk.bf16.mxu1 %vm452_vm0, %v451_v0  ;;  %v374_v6 = vld [vmem:[#allocation6 + $0x30] sm:$0xff]   ;;  %v369_v7 = vld [vmem:[#allocation3 + $0x18] sm:$0xff]   ;;  %v375_v8 = vld [vmem:[#allocation6 + $0x28] sm:$0xff]   ;;  %s274_s25 = sshll.u32 %s453_s24, 4  ;;  %s275_s25 = int_to_ptr.vmem [resolvable:$true] %s274_s25 }
  0x1f   :  { %319 = vmatpush3.bf16.msra.mxu0 %v365_v1  ;;  %339 = vmatpush3.bf16.msra.mxu1 %v373_v4  ;;  %v370_v9 = vld [vmem:[#allocation3 + $0x10] sm:$0xff]   ;;  %v376_v10 = vld [vmem:[#allocation6 + $0x20] sm:$0xff]   ;;  %v371_v11 = vld [vmem:[#allocation3 + $0x8] sm:$0xff]   ;;  %p426_p11 = scmp.lt.s32.totalorder %s275_s25, %s275_s25 }
  0x20   :  { %320 = vmatprep.subr.bf16.mxu0 %v451_v0  ;;  %340 = vmatprep.subr.bf16.mxu1 %v451_v0  ;;  %v377_v12 = vld [vmem:[#allocation6 + $0x18] sm:$0xff]   ;;  %v372_v13 = vld [vmem:[#allocation3] sm:$0xff]   ;;  %v378_v14 = vld [vmem:[#allocation6 + $0x10] sm:$0xff]  }
  0x21   :  { %v49_v15 = vld [vmem:[%s486_s0] sm:$0xf]  ;;  %v379_v16 = vld [vmem:[#allocation6 + $0x8] sm:$0xff]   ;;  %s421_s0 = scalar_lea.vmem %s275_s25, 128 }
  0x22   :  { %v380_v17 = vld [vmem:[#allocation6] sm:$0xff]   ;;  %p422_p10 = scmp.ne.s32.totalorder %s275_s25, %s421_s0  ;;  %p427_p12 = scmp.lt.s32.totalorder %s421_s0, %s421_s0 }
  0x23   :  { %321 = vmatpush3.bf16.msra.mxu0 %v366_v2  ;;  %341 = vmatpush3.bf16.msra.mxu1 %v374_v6 }
  0x24   :  { %322 = vmatprep.subr.bf16.mxu0 %v451_v0  ;;  %342 = vmatprep.subr.bf16.mxu1 %v451_v0  ;;  %p428_p13 = por %p427_p12, %p426_p11 }
  0x26   :  { %p429_p0 = pnand %p428_p13, %p422_p10 }
  0x27   :  { %323 = vmatpush3.bf16.msra.mxu0 %v367_v3  ;;  %343 = vmatpush3.bf16.msra.mxu1 %v375_v8 }
  0x28   :  { %324 = vmatprep.subr.bf16.mxu0 %v451_v0  ;;  %344 = vmatprep.subr.bf16.mxu1 %v451_v0 }
  0x2b   :  { %325 = vmatpush3.bf16.msra.mxu0 %v368_v5  ;;  %345 = vmatpush3.bf16.msra.mxu1 %v376_v10 }
  0x2c   :  { %326 = vmatprep.subr.bf16.mxu0 %v451_v0  ;;  %346 = vmatprep.subr.bf16.mxu1 %v451_v0 }
  0x2f   :  { %327 = vmatpush3.bf16.msra.mxu0 %v369_v7  ;;  %347 = vmatpush3.bf16.msra.mxu1 %v377_v12 }
  0x30   :  { %328 = vmatprep.subr.bf16.mxu0 %v451_v0  ;;  %348 = vmatprep.subr.bf16.mxu1 %v451_v0 }
  0x33   :  { %329 = vmatpush3.bf16.msra.mxu0 %v370_v9  ;;  %349 = vmatpush3.bf16.msra.mxu1 %v378_v14 }
  0x34   :  { %330 = vmatprep.subr.bf16.mxu0 %v451_v0  ;;  %350 = vmatprep.subr.bf16.mxu1 %v451_v0 }
  0x37   :  { %331 = vmatpush3.bf16.msra.mxu0 %v371_v11  ;;  %351 = vmatpush3.bf16.msra.mxu1 %v379_v16 }
  0x38   :  { %332 = vmatprep.subr.bf16.mxu0 %v451_v0  ;;  %352 = vmatprep.subr.bf16.mxu1 %v451_v0 }
  0x3b   :  { %333 = vmatpush3.bf16.msra.mxu0 %v372_v13  ;;  %353 = vmatpush3.bf16.msra.mxu1 %v380_v17 }
  0x3e   :  { %335 = vmatmul.mubr.bf16.vlgmr.msra.gmra.mxu0 %v49_v15 }
  0xfe   :  { %v148_v18 = vpop.f32.mrf.mxu0 }
  0xff   :  { %v154_v19 = vmax.f32 %v148_v18, 0.0 }
 0x100   :  { %v336_v20 = vpop.f32.mrf.mxu0 }
 0x101   :  { %v155_v21 = vpack.c.bf16 %v154_v19, %v154_v19 }
 0x102   :  { %v151_v22 = vpop.f32.mrf.mxu0 }
 0x103   :  { %355 = vmatmul.mubr.bf16.vlgmr.msra.gmra.mxu1 %v155_v21 }
 0x104   :  { %v337_v23 = vpop.f32.mrf.mxu0 }
 0x1c3   :  { %v255_v24 = vpop.f32.mrf.mxu1 }
 0x1c4   :  { %267 = vst [vmem:[#allocation8] sm:$0xff] %v255_v24 }
 0x1c5   :  { %v356_v25 = vpop.f32.mrf.mxu1 }
 0x1c6   :  { %432 = shalt.err (!%p429_p0)
}
 0x1c7   :  { %277 = dma.vmem_to_hbm [thread:$0]  %s275_s25, 128, %s489_s3, [#allocation5]   ;;  %v258_v26 = vpop.f32.mrf.mxu1 }
 0x1c9   :  { %v357_v27 = vpop.f32.mrf.mxu1 }
 0x1ca   :  { %445 = dma.done.wait [#allocation5], 128  }
 0x1cb   :  { %446 = vsyncadd [#allocation5], 4294967168 }
 0x1cc   :  { %281 = vsyncpa [#allocation4], 1 }
 0x1cd   :  { %282 = vsyncpa [#allocation7], 1 }
 0x1ce   :  { %283 = vsyncpa [#allocation5], 1 }

</bundles_post_ra>
